<compile_context>
chip_gen: v6e
topology: v6e:2x2x1
jax: 0.10.0
libtpu: 0.0.40
codegen_flags: <defaults>
</compile_context>

<pallas_src>
import jax
import jax.numpy as jnp
from jax import lax
from jax.experimental import pallas as pl
from jax.experimental.pallas import tpu as pltpu

EPS = 1e-3  # nn.BatchNorm2d(out_channels, 0.001) -> eps = 1e-3


def _downsampler_impl(x, w_conv, gamma, beta, alpha):
    """x: (N, Cin, H, W) float32 NCHW. Returns (N, Cout, H//2, W//2) float32."""
    N, Cin, H, W = x.shape
    Cc = w_conv.shape[0]            # Cout - Cin (conv output channels)
    Cout = Cin + Cc
    Ho, Wo = H // 2, W // 2
    Mimg = Ho * Wo                  # lane-dense per-image output size
    M = N * Mimg

    # ---- XLA glue (1x input-sized): space-to-depth phase planes -----------------------
    # xs[n, pr*2+pc, ci, ho*Wo+wo] = x[n, ci, 2*ho+pr, 2*wo+pc]
    xs = (x.astype(jnp.float32)
          .reshape(N, Cin, Ho, 2, Wo, 2)
          .transpose(0, 3, 5, 1, 2, 4)
          .reshape(N, 4, Cin, Mimg))

    # conv weights per tap: wt[kh*3+kw, cc, ci] = w_conv[cc, ci, kh, kw]
    wt = w_conv.astype(jnp.float32).transpose(2, 3, 0, 1).reshape(9, Cc, Cin)

    # kh (or kw) -> (phase index along that axis, output-space shift)
    # input row 2*ho + kh - 1:  kh=0 -> odd row of ho-1 ; kh=1 -> even row of ho ; kh=2 -> odd row of ho
    PHASE = {0: (1, -1), 1: (0, 0), 2: (1, 0)}

    def kernel(xs_ref, w_ref, y_ref, stats_ref):
        # lane-position helpers (computed once per grid step)
        col = lax.broadcasted_iota(jnp.int32, (1, Mimg), 1)
        not_first_col = (col % Wo) != 0            # wo != 0 (valid left-neighbour lanes)

        planes = [xs_ref[0, p] for p in range(4)]  # each (Cin, Mimg)

        # ---- 2x2 / stride-2 max pool == elementwise max of the 4 phase planes ----------
        pool = jnp.maximum(jnp.maximum(planes[0], planes[1]),
                           jnp.maximum(planes[2], planes[3]))        # (Cin, Mimg)

        # ---- 3x3 / stride-2 / pad-1 conv: 9 taps, each a shifted phase plane -----------
        conv = jnp.zeros((Cc, Mimg), jnp.float32)
        for kh in range(3):
            pr, dho = PHASE[kh]
            for kw in range(3):
                pc, dwo = PHASE[kw]
                plane = planes[pr * 2 + pc]
                r = -(dho * Wo + dwo)              # flat right-shift: 0, 1, Wo or Wo+1
                if r == 0:
                    tap = plane
                else:
                    # tap[m] = plane[m - r], zeros shifted in (top-row padding)
                    tap = jnp.concatenate(
                        [jnp.zeros((Cin, r), jnp.float32), plane[:, :Mimg - r]], axis=1)
                if dwo == -1:
                    # left-column padding: positions with wo == 0 must be zero
                    tap = jnp.where(not_first_col, tap, 0.0)
                conv = conv + jnp.dot(w_ref[kh * 3 + kw], tap,
                                      preferred_element_type=jnp.float32)

        # channel concat [pool | conv] written directly into y slices (no concatenate)
        y_ref[0, 0:Cin, :] = pool
        y_ref[0, Cin:Cout, :] = conv

        # per-image BN moments via lane reductions -> narrow stats output
        stats_ref[0, 0:Cin, :] = jnp.sum(pool, axis=1, keepdims=True)
        stats_ref[0, Cin:Cout, :] = jnp.sum(conv, axis=1, keepdims=True)
        stats_ref[0, Cout:Cout + Cin, :] = jnp.sum(pool * pool, axis=1, keepdims=True)
        stats_ref[0, Cout + Cin:, :] = jnp.sum(conv * conv, axis=1, keepdims=True)

    y, stats = pl.pallas_call(
        kernel,
        out_shape=(jax.ShapeDtypeStruct((N, Cout, Mimg), jnp.float32),
                   jax.ShapeDtypeStruct((N, 2 * Cout, 1), jnp.float32)),
        grid=(N,),
        in_specs=[
            pl.BlockSpec((1, 4, Cin, Mimg), lambda n: (n, 0, 0, 0)),   # phase planes
            pl.BlockSpec((9, Cc, Cin), lambda n: (0, 0, 0)),           # conv taps (resident)
        ],
        out_specs=(
            pl.BlockSpec((1, Cout, Mimg), lambda n: (n, 0, 0)),        # pre-BN activations
            pl.BlockSpec((1, 2 * Cout, 1), lambda n: (n, 0, 0)),       # per-image moments
        ),
        compiler_params=pltpu.CompilerParams(dimension_semantics=("parallel",)),
    )(xs, wt)

    # ---- finalize global BN statistics (tiny, plain JAX) --------------------------------
    totals = jnp.sum(stats[:, :, 0], axis=0)                  # (2*Cout,)
    mean = totals[:Cout] / M
    var = jnp.maximum(totals[Cout:] / M - mean * mean, 0.0)   # biased (training-mode) var
    scale = gamma.astype(jnp.float32) * lax.rsqrt(var + EPS)
    shift = beta.astype(jnp.float32) - mean * scale

    # ---- BN + PReLU: one XLA-fused elementwise pass; y is already N,C-major (no transpose)
    z = (y.reshape(N, Cout, Ho, Wo) * scale[None, :, None, None]
         + shift[None, :, None, None])
    return jnp.where(z >= 0.0, z, alpha.astype(jnp.float32)[None, :, None, None] * z)


downsampler = jax.jit(_downsampler_impl)


def downsampler_ref(x, w_conv, gamma, beta, alpha):
    """Pure-JAX reference mirroring the PyTorch forward (training-mode BN)."""
    pooled = lax.reduce_window(x, -jnp.inf, lax.max, (1, 1, 2, 2), (1, 1, 2, 2), 'VALID')
    conv = lax.conv_general_dilated(x, w_conv, (2, 2), ((1, 1), (1, 1)),
                                    dimension_numbers=('NCHW', 'OIHW', 'NCHW'))
    y = jnp.concatenate([pooled, conv], axis=1)
    mean = jnp.mean(y, axis=(0, 2, 3), keepdims=True)
    var = jnp.mean((y - mean) ** 2, axis=(0, 2, 3), keepdims=True)
    y = (y - mean) / jnp.sqrt(var + EPS) * gamma[None, :, None, None] + beta[None, :, None, None]
    return jnp.where(y >= 0, y, alpha[None, :, None, None] * y)


if __name__ == "__main__":
    key = jax.random.PRNGKey(0)
    k1, k2 = jax.random.split(key)

    N, Cin, H, W = 2, 4, 16, 16
    Cout = 8  # DownSampler(in_channels=4, out_channels=8)

    x = jax.random.normal(k1, (N, Cin, H, W), dtype=jnp.float32)
    # deterministic synthetic parameters (Conv2d bias=False; BN affine; PReLU init 0.25)
    w_conv = jax.random.normal(k2, (Cout - Cin, Cin, 3, 3), dtype=jnp.float32) * 0.1
    gamma = jnp.linspace(0.8, 1.2, Cout).astype(jnp.float32)
    beta = jnp.linspace(-0.1, 0.1, Cout).astype(jnp.float32)
    alpha = jnp.full((Cout,), 0.25, jnp.float32)

    out = jax.block_until_ready(downsampler(x, w_conv, gamma, beta, alpha))
    assert out.shape == (N, Cout, H // 2, W // 2), out.shape

    ref = downsampler_ref(x, w_conv, gamma, beta, alpha)
    err = float(jnp.max(jnp.abs(out - ref)))
    assert err < 1e-3, f"max abs err {err}"

    print("KERNEL_OK")
</pallas_src>

<mosaic_0001>
module attributes {stable_mosaic.version = 11 : i64} {
  func.func @kernel(%arg0: i32, %arg1: memref<1x4x4x64xf32, #tpu.memory_space<vmem>>, %arg2: memref<9x4x4xf32, #tpu.memory_space<vmem>>, %arg3: memref<1x8x64xf32, #tpu.memory_space<vmem>>, %arg4: memref<1x16x1xf32, #tpu.memory_space<vmem>>) attributes {dimension_semantics = [#tpu.dimension_semantics<parallel>], iteration_bounds = array<i64: 2>, scalar_prefetch = 0 : i64, scratch_operands = 0 : i64, tpu.core_type = #tpu.core_type<tc>, window_params = [{transform_indices = @transform_0, window_bounds = array<i64: 1, 4, 4, 64>}, {pipeline_mode = #tpu.pipeline_mode<synchronous>, transform_indices = @transform_1, window_bounds = array<i64: 9, 4, 4>}, {transform_indices = @transform_2, window_bounds = array<i64: 1, 8, 64>}, {transform_indices = @transform_3, window_bounds = array<i64: 1, 16, 1>}]} {
    %0 = tpu.iota {dimensions = array<i32: 1>} : vector<1x64xi32>
    %c8_i32 = arith.constant 8 : i32
    %c0_i32 = arith.constant 0 : i32
    %1 = arith.cmpi eq, %c8_i32, %c0_i32 : i32
    %c1_i32 = arith.constant 1 : i32
    %2 = arith.select %1, %c1_i32, %c8_i32 : i32
    %3 = vector.broadcast %2 : i32 to vector<1x64xi32>
    %4 = arith.remsi %0, %3 : vector<1x64xi32>
    %c0_i32_0 = arith.constant 0 : i32
    %5 = vector.broadcast %c0_i32_0 : i32 to vector<1x64xi32>
    %6 = arith.cmpi ne, %4, %5 : vector<1x64xi32>
    %c0_i32_1 = arith.constant 0 : i32
    %7 = vector.broadcast %c0_i32_1 : i32 to vector<1x64xi32>
    %8 = arith.cmpi slt, %4, %7 : vector<1x64xi32>
    %c0_i32_2 = arith.constant 0 : i32
    %9 = arith.cmpi slt, %2, %c0_i32_2 : i32
    %10 = vector.broadcast %9 : i1 to vector<1x64xi1>
    %11 = vector.broadcast %10 : vector<1x64xi1> to vector<1x64xi1>
    %12 = arith.xori %8, %11 : vector<1x64xi1>
    %13 = arith.andi %12, %6 : vector<1x64xi1>
    %14 = vector.broadcast %2 : i32 to vector<1x64xi32>
    %15 = arith.addi %4, %14 : vector<1x64xi32>
    %16 = arith.select %13, %15, %4 : vector<1x64xi1>, vector<1x64xi32>
    %c0_i32_3 = arith.constant 0 : i32
    %17 = vector.broadcast %c0_i32_3 : i32 to vector<1x64xi32>
    %18 = arith.cmpi ne, %16, %17 : vector<1x64xi32>
    %c0 = arith.constant 0 : index
    %c0_4 = arith.constant 0 : index
    %c0_5 = arith.constant 0 : index
    %c0_6 = arith.constant 0 : index
    %19 = vector.load %arg1[%c0, %c0_4, %c0_5, %c0_6] : memref<1x4x4x64xf32, #tpu.memory_space<vmem>>, vector<1x1x4x64xf32>
    %20 = vector.shape_cast %19 : vector<1x1x4x64xf32> to vector<4x64xf32>
    %c0_7 = arith.constant 0 : index
    %c1 = arith.constant 1 : index
    %c0_8 = arith.constant 0 : index
    %c0_9 = arith.constant 0 : index
    %21 = vector.load %arg1[%c0_7, %c1, %c0_8, %c0_9] : memref<1x4x4x64xf32, #tpu.memory_space<vmem>>, vector<1x1x4x64xf32>
    %22 = vector.shape_cast %21 : vector<1x1x4x64xf32> to vector<4x64xf32>
    %c0_10 = arith.constant 0 : index
    %c2 = arith.constant 2 : index
    %c0_11 = arith.constant 0 : index
    %c0_12 = arith.constant 0 : index
    %23 = vector.load %arg1[%c0_10, %c2, %c0_11, %c0_12] : memref<1x4x4x64xf32, #tpu.memory_space<vmem>>, vector<1x1x4x64xf32>
    %24 = vector.shape_cast %23 : vector<1x1x4x64xf32> to vector<4x64xf32>
    %c0_13 = arith.constant 0 : index
    %c3 = arith.constant 3 : index
    %c0_14 = arith.constant 0 : index
    %c0_15 = arith.constant 0 : index
    %25 = vector.load %arg1[%c0_13, %c3, %c0_14, %c0_15] : memref<1x4x4x64xf32, #tpu.memory_space<vmem>>, vector<1x1x4x64xf32>
    %26 = vector.shape_cast %25 : vector<1x1x4x64xf32> to vector<4x64xf32>
    %27 = arith.maximumf %20, %22 : vector<4x64xf32>
    %28 = arith.maximumf %24, %26 : vector<4x64xf32>
    %29 = arith.maximumf %27, %28 : vector<4x64xf32>
    %cst = arith.constant 0.000000e+00 : f32
    %30 = vector.broadcast %cst : f32 to vector<4x64xf32>
    %cst_16 = arith.constant 0.000000e+00 : f32
    %31 = vector.broadcast %cst_16 : f32 to vector<4x9xf32>
    %32 = vector.extract_strided_slice %26 {offsets = [0, 0], sizes = [4, 55], strides = [1, 1]} : vector<4x64xf32> to vector<4x55xf32>
    %33 = tpu.concatenate %31, %32 in 1 : vector<4x9xf32>, vector<4x55xf32> -> vector<4x64xf32>
    %cst_17 = arith.constant 0.000000e+00 : f32
    %34 = vector.shape_cast %18 : vector<1x64xi1> to vector<1x64xi1>
    %35 = vector.broadcast %34 : vector<1x64xi1> to vector<4x64xi1>
    %36 = vector.broadcast %cst_17 : f32 to vector<4x64xf32>
    %37 = arith.select %35, %33, %36 : vector<4x64xi1>, vector<4x64xf32>
    %c0_18 = arith.constant 0 : index
    %c0_19 = arith.constant 0 : index
    %c0_20 = arith.constant 0 : index
    %38 = vector.load %arg2[%c0_18, %c0_19, %c0_20] : memref<9x4x4xf32, #tpu.memory_space<vmem>>, vector<1x4x4xf32>
    %39 = vector.shape_cast %38 : vector<1x4x4xf32> to vector<4x4xf32>
    %cst_21 = arith.constant dense<0.000000e+00> : vector<4x64xf32>
    %40 = tpu.matmul %39, %37, %cst_21 {dimension_numbers = #tpu.dot_dimension_numbers<[1], [0], [0], [1], [0, 0, 1, 1], [], []>} : vector<4x4xf32>, vector<4x64xf32>, vector<4x64xf32> -> vector<4x64xf32>
    %41 = arith.addf %30, %40 : vector<4x64xf32>
    %cst_22 = arith.constant 0.000000e+00 : f32
    %42 = vector.broadcast %cst_22 : f32 to vector<4x8xf32>
    %43 = vector.extract_strided_slice %24 {offsets = [0, 0], sizes = [4, 56], strides = [1, 1]} : vector<4x64xf32> to vector<4x56xf32>
    %44 = tpu.concatenate %42, %43 in 1 : vector<4x8xf32>, vector<4x56xf32> -> vector<4x64xf32>
    %c1_23 = arith.constant 1 : index
    %c0_24 = arith.constant 0 : index
    %c0_25 = arith.constant 0 : index
    %45 = vector.load %arg2[%c1_23, %c0_24, %c0_25] : memref<9x4x4xf32, #tpu.memory_space<vmem>>, vector<1x4x4xf32>
    %46 = vector.shape_cast %45 : vector<1x4x4xf32> to vector<4x4xf32>
    %cst_26 = arith.constant dense<0.000000e+00> : vector<4x64xf32>
    %47 = tpu.matmul %46, %44, %cst_26 {dimension_numbers = #tpu.dot_dimension_numbers<[1], [0], [0], [1], [0, 0, 1, 1], [], []>} : vector<4x4xf32>, vector<4x64xf32>, vector<4x64xf32> -> vector<4x64xf32>
    %48 = arith.addf %41, %47 : vector<4x64xf32>
    %cst_27 = arith.constant 0.000000e+00 : f32
    %49 = vector.broadcast %cst_27 : f32 to vector<4x8xf32>
    %50 = vector.extract_strided_slice %26 {offsets = [0, 0], sizes = [4, 56], strides = [1, 1]} : vector<4x64xf32> to vector<4x56xf32>
    %51 = tpu.concatenate %49, %50 in 1 : vector<4x8xf32>, vector<4x56xf32> -> vector<4x64xf32>
    %c2_28 = arith.constant 2 : index
    %c0_29 = arith.constant 0 : index
    %c0_30 = arith.constant 0 : index
    %52 = vector.load %arg2[%c2_28, %c0_29, %c0_30] : memref<9x4x4xf32, #tpu.memory_space<vmem>>, vector<1x4x4xf32>
    %53 = vector.shape_cast %52 : vector<1x4x4xf32> to vector<4x4xf32>
    %cst_31 = arith.constant dense<0.000000e+00> : vector<4x64xf32>
    %54 = tpu.matmul %53, %51, %cst_31 {dimension_numbers = #tpu.dot_dimension_numbers<[1], [0], [0], [1], [0, 0, 1, 1], [], []>} : vector<4x4xf32>, vector<4x64xf32>, vector<4x64xf32> -> vector<4x64xf32>
    %55 = arith.addf %48, %54 : vector<4x64xf32>
    %cst_32 = arith.constant 0.000000e+00 : f32
    %56 = vector.broadcast %cst_32 : f32 to vector<4x1xf32>
    %57 = vector.extract_strided_slice %22 {offsets = [0, 0], sizes = [4, 63], strides = [1, 1]} : vector<4x64xf32> to vector<4x63xf32>
    %58 = tpu.concatenate %56, %57 in 1 : vector<4x1xf32>, vector<4x63xf32> -> vector<4x64xf32>
    %cst_33 = arith.constant 0.000000e+00 : f32
    %59 = vector.shape_cast %18 : vector<1x64xi1> to vector<1x64xi1>
    %60 = vector.broadcast %59 : vector<1x64xi1> to vector<4x64xi1>
    %61 = vector.broadcast %cst_33 : f32 to vector<4x64xf32>
    %62 = arith.select %60, %58, %61 : vector<4x64xi1>, vector<4x64xf32>
    %c3_34 = arith.constant 3 : index
    %c0_35 = arith.constant 0 : index
    %c0_36 = arith.constant 0 : index
    %63 = vector.load %arg2[%c3_34, %c0_35, %c0_36] : memref<9x4x4xf32, #tpu.memory_space<vmem>>, vector<1x4x4xf32>
    %64 = vector.shape_cast %63 : vector<1x4x4xf32> to vector<4x4xf32>
    %cst_37 = arith.constant dense<0.000000e+00> : vector<4x64xf32>
    %65 = tpu.matmul %64, %62, %cst_37 {dimension_numbers = #tpu.dot_dimension_numbers<[1], [0], [0], [1], [0, 0, 1, 1], [], []>} : vector<4x4xf32>, vector<4x64xf32>, vector<4x64xf32> -> vector<4x64xf32>
    %66 = arith.addf %55, %65 : vector<4x64xf32>
    %c4 = arith.constant 4 : index
    %c0_38 = arith.constant 0 : index
    %c0_39 = arith.constant 0 : index
    %67 = vector.load %arg2[%c4, %c0_38, %c0_39] : memref<9x4x4xf32, #tpu.memory_space<vmem>>, vector<1x4x4xf32>
    %68 = vector.shape_cast %67 : vector<1x4x4xf32> to vector<4x4xf32>
    %cst_40 = arith.constant dense<0.000000e+00> : vector<4x64xf32>
    %69 = tpu.matmul %68, %20, %cst_40 {dimension_numbers = #tpu.dot_dimension_numbers<[1], [0], [0], [1], [0, 0, 1, 1], [], []>} : vector<4x4xf32>, vector<4x64xf32>, vector<4x64xf32> -> vector<4x64xf32>
    %70 = arith.addf %66, %69 : vector<4x64xf32>
    %c5 = arith.constant 5 : index
    %c0_41 = arith.constant 0 : index
    %c0_42 = arith.constant 0 : index
    %71 = vector.load %arg2[%c5, %c0_41, %c0_42] : memref<9x4x4xf32, #tpu.memory_space<vmem>>, vector<1x4x4xf32>
    %72 = vector.shape_cast %71 : vector<1x4x4xf32> to vector<4x4xf32>
    %cst_43 = arith.constant dense<0.000000e+00> : vector<4x64xf32>
    %73 = tpu.matmul %72, %22, %cst_43 {dimension_numbers = #tpu.dot_dimension_numbers<[1], [0], [0], [1], [0, 0, 1, 1], [], []>} : vector<4x4xf32>, vector<4x64xf32>, vector<4x64xf32> -> vector<4x64xf32>
    %74 = arith.addf %70, %73 : vector<4x64xf32>
    %cst_44 = arith.constant 0.000000e+00 : f32
    %75 = vector.broadcast %cst_44 : f32 to vector<4x1xf32>
    %76 = vector.extract_strided_slice %26 {offsets = [0, 0], sizes = [4, 63], strides = [1, 1]} : vector<4x64xf32> to vector<4x63xf32>
    %77 = tpu.concatenate %75, %76 in 1 : vector<4x1xf32>, vector<4x63xf32> -> vector<4x64xf32>
    %cst_45 = arith.constant 0.000000e+00 : f32
    %78 = vector.shape_cast %18 : vector<1x64xi1> to vector<1x64xi1>
    %79 = vector.broadcast %78 : vector<1x64xi1> to vector<4x64xi1>
    %80 = vector.broadcast %cst_45 : f32 to vector<4x64xf32>
    %81 = arith.select %79, %77, %80 : vector<4x64xi1>, vector<4x64xf32>
    %c6 = arith.constant 6 : index
    %c0_46 = arith.constant 0 : index
    %c0_47 = arith.constant 0 : index
    %82 = vector.load %arg2[%c6, %c0_46, %c0_47] : memref<9x4x4xf32, #tpu.memory_space<vmem>>, vector<1x4x4xf32>
    %83 = vector.shape_cast %82 : vector<1x4x4xf32> to vector<4x4xf32>
    %cst_48 = arith.constant dense<0.000000e+00> : vector<4x64xf32>
    %84 = tpu.matmul %83, %81, %cst_48 {dimension_numbers = #tpu.dot_dimension_numbers<[1], [0], [0], [1], [0, 0, 1, 1], [], []>} : vector<4x4xf32>, vector<4x64xf32>, vector<4x64xf32> -> vector<4x64xf32>
    %85 = arith.addf %74, %84 : vector<4x64xf32>
    %c7 = arith.constant 7 : index
    %c0_49 = arith.constant 0 : index
    %c0_50 = arith.constant 0 : index
    %86 = vector.load %arg2[%c7, %c0_49, %c0_50] : memref<9x4x4xf32, #tpu.memory_space<vmem>>, vector<1x4x4xf32>
    %87 = vector.shape_cast %86 : vector<1x4x4xf32> to vector<4x4xf32>
    %cst_51 = arith.constant dense<0.000000e+00> : vector<4x64xf32>
    %88 = tpu.matmul %87, %24, %cst_51 {dimension_numbers = #tpu.dot_dimension_numbers<[1], [0], [0], [1], [0, 0, 1, 1], [], []>} : vector<4x4xf32>, vector<4x64xf32>, vector<4x64xf32> -> vector<4x64xf32>
    %89 = arith.addf %85, %88 : vector<4x64xf32>
    %c8 = arith.constant 8 : index
    %c0_52 = arith.constant 0 : index
    %c0_53 = arith.constant 0 : index
    %90 = vector.load %arg2[%c8, %c0_52, %c0_53] : memref<9x4x4xf32, #tpu.memory_space<vmem>>, vector<1x4x4xf32>
    %91 = vector.shape_cast %90 : vector<1x4x4xf32> to vector<4x4xf32>
    %cst_54 = arith.constant dense<0.000000e+00> : vector<4x64xf32>
    %92 = tpu.matmul %91, %26, %cst_54 {dimension_numbers = #tpu.dot_dimension_numbers<[1], [0], [0], [1], [0, 0, 1, 1], [], []>} : vector<4x4xf32>, vector<4x64xf32>, vector<4x64xf32> -> vector<4x64xf32>
    %93 = arith.addf %89, %92 : vector<4x64xf32>
    %c0_55 = arith.constant 0 : index
    %c0_56 = arith.constant 0 : index
    %c0_57 = arith.constant 0 : index
    %94 = vector.load %arg3[%c0_55, %c0_56, %c0_57] : memref<1x8x64xf32, #tpu.memory_space<vmem>>, vector<1x4x64xf32>
    %95 = vector.shape_cast %94 : vector<1x4x64xf32> to vector<4x64xf32>
    %96 = vector.shape_cast %29 : vector<4x64xf32> to vector<1x4x64xf32>
    tpu.vector_store %arg3[%c0_55, %c0_56, %c0_57], %96 {strides = array<i32>} : memref<1x8x64xf32, #tpu.memory_space<vmem>>, vector<1x4x64xf32>,
    %c0_58 = arith.constant 0 : index
    %c4_59 = arith.constant 4 : index
    %c0_60 = arith.constant 0 : index
    %97 = vector.load %arg3[%c0_58, %c4_59, %c0_60] : memref<1x8x64xf32, #tpu.memory_space<vmem>>, vector<1x4x64xf32>
    %98 = vector.shape_cast %97 : vector<1x4x64xf32> to vector<4x64xf32>
    %99 = vector.shape_cast %93 : vector<4x64xf32> to vector<1x4x64xf32>
    tpu.vector_store %arg3[%c0_58, %c4_59, %c0_60], %99 {strides = array<i32>} : memref<1x8x64xf32, #tpu.memory_space<vmem>>, vector<1x4x64xf32>,
    %cst_61 = arith.constant dense<0.000000e+00> : vector<4xf32>
    %100 = vector.multi_reduction <add>, %29, %cst_61 [1] : vector<4x64xf32> to vector<4xf32>
    %101 = vector.shape_cast %100 : vector<4xf32> to vector<4x1xf32>
    %c0_62 = arith.constant 0 : index
    %c0_63 = arith.constant 0 : index
    %c0_64 = arith.constant 0 : index
    %102 = vector.load %arg4[%c0_62, %c0_63, %c0_64] : memref<1x16x1xf32, #tpu.memory_space<vmem>>, vector<1x4x1xf32>
    %103 = vector.shape_cast %102 : vector<1x4x1xf32> to vector<4x1xf32>
    %104 = vector.shape_cast %101 : vector<4x1xf32> to vector<1x4x1xf32>
    tpu.vector_store %arg4[%c0_62, %c0_63, %c0_64], %104 {strides = array<i32>} : memref<1x16x1xf32, #tpu.memory_space<vmem>>, vector<1x4x1xf32>,
    %cst_65 = arith.constant dense<0.000000e+00> : vector<4xf32>
    %105 = vector.multi_reduction <add>, %93, %cst_65 [1] : vector<4x64xf32> to vector<4xf32>
    %106 = vector.shape_cast %105 : vector<4xf32> to vector<4x1xf32>
    %c0_66 = arith.constant 0 : index
    %c4_67 = arith.constant 4 : index
    %c0_68 = arith.constant 0 : index
    %107 = vector.load %arg4[%c0_66, %c4_67, %c0_68] : memref<1x16x1xf32, #tpu.memory_space<vmem>>, vector<1x4x1xf32>
    %108 = vector.shape_cast %107 : vector<1x4x1xf32> to vector<4x1xf32>
    %109 = vector.shape_cast %106 : vector<4x1xf32> to vector<1x4x1xf32>
    tpu.vector_store %arg4[%c0_66, %c4_67, %c0_68], %109 {strides = array<i32>} : memref<1x16x1xf32, #tpu.memory_space<vmem>>, vector<1x4x1xf32>,
    %110 = arith.mulf %29, %29 : vector<4x64xf32>
    %cst_69 = arith.constant dense<0.000000e+00> : vector<4xf32>
    %111 = vector.multi_reduction <add>, %110, %cst_69 [1] : vector<4x64xf32> to vector<4xf32>
    %112 = vector.shape_cast %111 : vector<4xf32> to vector<4x1xf32>
    %c0_70 = arith.constant 0 : index
    %c8_71 = arith.constant 8 : index
    %c0_72 = arith.constant 0 : index
    %113 = vector.load %arg4[%c0_70, %c8_71, %c0_72] : memref<1x16x1xf32, #tpu.memory_space<vmem>>, vector<1x4x1xf32>
    %114 = vector.shape_cast %113 : vector<1x4x1xf32> to vector<4x1xf32>
    %115 = vector.shape_cast %112 : vector<4x1xf32> to vector<1x4x1xf32>
    tpu.vector_store %arg4[%c0_70, %c8_71, %c0_72], %115 {strides = array<i32>} : memref<1x16x1xf32, #tpu.memory_space<vmem>>, vector<1x4x1xf32>,
    %116 = arith.mulf %93, %93 : vector<4x64xf32>
    %cst_73 = arith.constant dense<0.000000e+00> : vector<4xf32>
    %117 = vector.multi_reduction <add>, %116, %cst_73 [1] : vector<4x64xf32> to vector<4xf32>
    %118 = vector.shape_cast %117 : vector<4xf32> to vector<4x1xf32>
    %c0_74 = arith.constant 0 : index
    %c12 = arith.constant 12 : index
    %c0_75 = arith.constant 0 : index
    %119 = vector.load %arg4[%c0_74, %c12, %c0_75] : memref<1x16x1xf32, #tpu.memory_space<vmem>>, vector<1x4x1xf32>
    %120 = vector.shape_cast %119 : vector<1x4x1xf32> to vector<4x1xf32>
    %121 = vector.shape_cast %118 : vector<4x1xf32> to vector<1x4x1xf32>
    tpu.vector_store %arg4[%c0_74, %c12, %c0_75], %121 {strides = array<i32>} : memref<1x16x1xf32, #tpu.memory_space<vmem>>, vector<1x4x1xf32>,
    return
  }
  func.func @transform_0(%arg0: i32) -> (i32, i32, i32, i32) {
    %c0_i32 = arith.constant 0 : i32
    %c0_i32_0 = arith.constant 0 : i32
    %c0_i32_1 = arith.constant 0 : i32
    %c0_i32_2 = arith.constant 0 : i32
    return %arg0, %c0_i32, %c0_i32_0, %c0_i32_1 : i32, i32, i32, i32
  }
  func.func @transform_1(%arg0: i32) -> (i32, i32, i32) {
    %c0_i32 = arith.constant 0 : i32
    %c0_i32_0 = arith.constant 0 : i32
    %c0_i32_1 = arith.constant 0 : i32
    %c0_i32_2 = arith.constant 0 : i32
    return %c0_i32, %c0_i32_0, %c0_i32_1 : i32, i32, i32
  }
  func.func @transform_2(%arg0: i32) -> (i32, i32, i32) {
    %c0_i32 = arith.constant 0 : i32
    %c0_i32_0 = arith.constant 0 : i32
    %c0_i32_1 = arith.constant 0 : i32
    return %arg0, %c0_i32, %c0_i32_0 : i32, i32, i32
  }
  func.func @transform_3(%arg0: i32) -> (i32, i32, i32) {
    %c0_i32 = arith.constant 0 : i32
    %c0_i32_0 = arith.constant 0 : i32
    %c0_i32_1 = arith.constant 0 : i32
    return %arg0, %c0_i32, %c0_i32_0 : i32, i32, i32
  }
}

</mosaic_0001>

<bundles_post_ra>
// kernel: _downsampler_impl.1
= control target key start
LH: loop header
LB: loop body
LE: loop exit
PB: predicated region body
PF: predicated region fallthrough
CT: control target
= control target key end

     0   :  { %s1205_s12 = smov 0   ;;  %s1350_s0 = inlined_call_operand.vmem [shape: f32[2,4,4,64], index: 0, kind: input, shape index: {}]   ;;  %s1351_s1 = inlined_call_operand.vmem [shape: f32[9,4,4], index: 1, kind: input, shape index: {}]   ;;  %s1352_s2 = inlined_call_operand.vmem [shape: f32[2,8,64], index: 2, kind: output, shape index: {0}]   ;;  %s1353_s3 = inlined_call_operand.vmem [shape: f32[2,16,1], index: 3, kind: output, shape index: {1}]  }
   0x1 LB: > { %s1053_s13 = sadd.s32 4294967295, %s1178_s12   ;;  %p1057_p0 = scmp.ge.s32.totalorder %s1178_s12, 1  ;;  %s1178_s12 = sphi %s1205_s12, %s14_s12  }
   0x2   : > { %p140_p1 = scmp.lt.s32.totalorder %s1178_s12, 3 }
   0x4   : > { %p141_p2 = pnand %p1057_p0, %p140_p1 }
   0x5   : > { %p168_p3 = scmp.lt.s32.totalorder (!%p141_p2), %s1053_s13, 1  ;;  %s1182_s18 = smov (!%p141_p2), 8  }
   0x6   : > { %144 = sbr.rel (%p141_p2) target bundleno = 490 (0x1ea), region = 28  ;;  %s1183_s19 = smov (!%p141_p2), 9  }
   0x7   : > { %s1184_s20 = smov (!%p141_p2), 1  }
   0xb   : > { %v1180_v0 = vmov 0.0   ;;  %vm1181_vm0 = vmmov 0   ;;  %s1357_s13 = smov (!%p168_p3, %s1053_s13), 1  ;;  %v182_v4 = vlaneseq  ;;  %vm221_vm1 = vcmask 64512   ;;  %v1066_v9 = vld [vmem:[%s1351_s1 + $0x4] sm:$0xf] }
   0xc   : > { %1114 = vmatprep.subr.mxu0 %v1180_v0  ;;  %1116 = vmatprep.mubr.msk.f32.mxu0 %vm1181_vm0, %v1180_v0  ;;  %s1094_s14 = sshll.u32 %s1357_s13, 4  ;;  %vm229_vm2 = vcmask 1043456   ;;  %vm225_vm3 = vcmask 31744   ;;  %vm211_vm4 = vcmask 72704   ;;  %vm466_vm5 = vcmask 7168   ;;  %s1060_s15 = sshll.u32 %s1357_s13, 3 }
   0xd   : > { %1119 = vmatprep.subr.mxu1 %v1180_v0  ;;  %1121 = vmatprep.mubr.msk.f32.mxu1 %vm1181_vm0, %v1180_v0  ;;  %s1227_s17 = scalar_lea.vmem %s1350_s0, %s1094_s14  ;;  %v183_v5 = vand.u32 127, %v182_v4  ;;  %v1071_v15 = vld [vmem:[%s1351_s1 + $0x8] sm:$0xf]  ;;  %v216_v18 = vld [vmem:[%s1351_s1] sm:$0xf]  ;;  %vm945_vm7 = vcmask 519168   ;;  %s181_s21 = scalar_lea.vmem %s1353_s3, %s1094_s14 }
   0xe   : > { %v1230_v1 = vld [vmem:[%s1227_s17 + $0x8] sm:$0xf]  ;;  %v1233_v2 = vld [vmem:[%s1227_s17 + $0xc] sm:$0xf]  ;;  %v1238_v3 = vld [vmem:[%s1227_s17 + $0x4] sm:$0xf] }
   0xf   : > { %218 = vrot.lane.b32.xlu0 %v1230_v1, %s1182_s18  ;;  %379 = vrot.lane.b32.xlu1 %v1233_v2, %s1182_s18  ;;  %v188_v6 = vand.u32 7, %v183_v5  ;;  %v197_v21 = vld [vmem:[%s1227_s17] sm:$0xf]  ;;  %v1077_v23 = vld [vmem:[%s1351_s1 + $0x10] sm:$0xf]  ;;  %v205_v31 = vmax.f32 %v1230_v1, %v1233_v2  ;;  %s1332_s18 = scalar_lea.vmem %s1352_s2, %s1060_s15  ;;  %vm951_vm8 = vcmask 3072  }
  0x10   : > { %v1074_v25 = vld [vmem:[%s1351_s1 + $0xc] sm:$0xf]  ;;  %v1083_v27 = vld [vmem:[%s1351_s1 + $0x18] sm:$0xf]  ;;  %v1080_v28 = vld [vmem:[%s1351_s1 + $0x14] sm:$0xf]  ;;  %v204_v32 = vmax.f32 %v197_v21, %v1238_v3 }
  0x11   : > { %vm1249_vm6 = vcmp.ne.s32.totalorder %v188_v6, 0  ;;  %v1089_v29 = vld [vmem:[%s1351_s1 + $0x20] sm:$0xf]  ;;  %v1086_v30 = vld [vmem:[%s1351_s1 + $0x1c] sm:$0xf] }
  0x12   : > { %v206_v33 = vmax.f32 %v204_v32, %v205_v31 }
  0x13   : > { %208 = vrot.lane.b32.xlu0 %v1233_v2, %s1183_s19  ;;  %463 = vrot.lane.b32.xlu1 %v1238_v3, %s1184_s20 }
  0x14   : > { %v948_v34 = vsel %vm945_vm7, %v206_v33, 0.0  ;;  %946 = vst.msk [vmem:[%s1332_s18] sm:$0xf] %vm945_vm7, %v206_v33  ;;  %v957_v61 = vmul.f32 %v206_v33, %v206_v33 }
  0x17   : > { %705 = vrot.lane.b32.xlu0 %v1233_v2, %s1184_s20 }
  0x37   : > { %949 = vadd.xlane.f32.xlu1 %v948_v34 }
  0x81   : > { %v219_v7 = vpop.permute.xlu0 %218  ;;  %v380_v8 = vpop.permute.xlu1 %379 }
  0x82   : > { %v222_v10 = vsel %vm221_vm1, 0.0, %v219_v7  ;;  %v382_v11 = vsel %vm221_vm1, 0.0, %v380_v8 }
  0x83   : > { %1115 = vmatpush3.msk.msra.mxu0 %vm229_vm2, %v222_v10 }
  0x84   : > { %1124 = vmatprep.subr.mxu0 %v1180_v0  ;;  %1117 = vmatmul.mubr.msk.f32.vlgmr.msra.gmra.mxu0 %vm225_vm3, %v1066_v9 }
  0x85   : > { %1125 = vmatpush3.msk.msra.mxu0 %vm229_vm2, %v382_v11  ;;  %v209_v13 = vpop.permute.xlu0 %208  ;;  %v464_v14 = vpop.permute.xlu1 %463  ;;  %1126 = vmatprep.mubr.msk.f32.mxu0 %vm1181_vm0, %v1180_v0 }
  0x86   : > { %v212_v16 = vsel %vm211_vm4, 0.0, %v209_v13  ;;  %v467_v17 = vsel %vm466_vm5, 0.0, %v464_v14  ;;  %1134 = vmatprep.subr.mxu0 %v1180_v0 }
  0x87   : > { %v215_v19 = vsel %vm1249_vm6, %v212_v16, 0.0  ;;  %v468_v20 = vsel %vm1249_vm6, %v467_v17, 0.0 }
  0x88   : > { %1120 = vmatpush3.msk.msra.mxu1 %vm229_vm2, %v215_v19  ;;  %1127 = vmatmul.mubr.msk.f32.vlgmr.msra.gmra.mxu0 %vm225_vm3, %v1071_v15 }
  0x89   : > { %1122 = vmatmul.mubr.msk.f32.vlgmr.msra.gmra.mxu1 %vm225_vm3, %v216_v18  ;;  %1129 = vmatprep.subr.mxu1 %v1180_v0  ;;  %v706_v22 = vpop.permute.xlu0 %705 }
  0x8a   : > { %1130 = vmatpush3.msk.msra.mxu1 %vm229_vm2, %v468_v20  ;;  %1131 = vmatprep.mubr.msk.f32.mxu1 %vm1181_vm0, %v1180_v0  ;;  %v708_v24 = vsel %vm466_vm5, 0.0, %v706_v22 }
  0x8b   : > { %1135 = vmatpush3.msk.msra.mxu0 %vm229_vm2, %v197_v21  ;;  %1136 = vmatprep.mubr.msk.f32.mxu0 %vm1181_vm0, %v1180_v0  ;;  %v709_v26 = vsel %vm1249_vm6, %v708_v24, 0.0 }
  0x8c   : > { %1139 = vmatprep.subr.mxu1 %v1180_v0  ;;  %1137 = vmatmul.mubr.msk.f32.vlgmr.msra.gmra.mxu0 %vm225_vm3, %v1077_v23 }
  0x8d   : > { %1132 = vmatmul.mubr.msk.f32.vlgmr.msra.gmra.mxu1 %vm225_vm3, %v1074_v25  ;;  %1144 = vmatprep.subr.mxu0 %v1180_v0 }
  0x8e   : > { %1140 = vmatpush3.msk.msra.mxu1 %vm229_vm2, %v1238_v3  ;;  %1141 = vmatprep.mubr.msk.f32.mxu1 %vm1181_vm0, %v1180_v0 }
  0x8f   : > { %1145 = vmatpush3.msk.msra.mxu0 %vm229_vm2, %v709_v26  ;;  %1146 = vmatprep.mubr.msk.f32.mxu0 %vm1181_vm0, %v1180_v0 }
  0x90   : > { %1149 = vmatprep.subr.mxu1 %v1180_v0  ;;  %1147 = vmatmul.mubr.msk.f32.vlgmr.msra.gmra.mxu0 %vm225_vm3, %v1083_v27 }
  0x91   : > { %1142 = vmatmul.mubr.msk.f32.vlgmr.msra.gmra.mxu1 %vm225_vm3, %v1080_v28  ;;  %1154 = vmatprep.subr.mxu0 %v1180_v0 }
  0x92   : > { %1150 = vmatpush3.msk.msra.mxu1 %vm229_vm2, %v1230_v1  ;;  %1151 = vmatprep.mubr.msk.f32.mxu1 %vm1181_vm0, %v1180_v0  ;;  %v958_v1 = vsel %vm945_vm7, %v957_v61, 0.0 }
  0x93   : > { %1155 = vmatpush3.msk.msra.mxu0 %vm229_vm2, %v1233_v2  ;;  %1156 = vmatprep.mubr.msk.f32.mxu0 %vm1181_vm0, %v1180_v0 }
  0x94   : > { %1157 = vmatmul.mubr.msk.f32.vlgmr.msra.gmra.mxu0 %vm225_vm3, %v1089_v29 }
  0x95   : > { %1152 = vmatmul.mubr.msk.f32.vlgmr.msra.gmra.mxu1 %vm225_vm3, %v1086_v30 }
  0xc0   : > { %v950_v2 = vpop.xlane.xlu1 %949 }
  0xc1   : > { %952 = vst.msk [vmem:[%s181_s21] sm:$0xf] %vm951_vm8, %v950_v2 }
 0x144   : > { %v299_v35 = vpop.f32.mrf.mxu0 }
 0x146   : > { %v1118_v36 = vpop.f32.mrf.mxu0 }
 0x148   : > { %v457_v37 = vpop.f32.mrf.mxu0 }
 0x149   : > { %v375_v38 = vpop.f32.mrf.mxu1 }
 0x14a   : > { %v376_v39 = vadd.f32 %v375_v38, %v299_v35  ;;  %v1128_v40 = vpop.f32.mrf.mxu0 }
 0x14b   : > { %v1123_v41 = vpop.f32.mrf.mxu1 }
 0x14c   : > { %v461_v42 = vadd.f32 %v457_v37, %v376_v39  ;;  %v622_v43 = vpop.f32.mrf.mxu0 }
 0x14d   : > { %v543_v44 = vpop.f32.mrf.mxu1 }
 0x14e   : > { %v547_v45 = vadd.f32 %v543_v44, %v461_v42  ;;  %v1138_v46 = vpop.f32.mrf.mxu0 }
 0x14f   : > { %v1133_v47 = vpop.f32.mrf.mxu1 }
 0x150   : > { %v626_v48 = vadd.f32 %v622_v43, %v547_v45  ;;  %v784_v49 = vpop.f32.mrf.mxu0 }
 0x151   : > { %v700_v50 = vpop.f32.mrf.mxu1 }
 0x152   : > { %v704_v51 = vadd.f32 %v700_v50, %v626_v48  ;;  %v1148_v52 = vpop.f32.mrf.mxu0 }
 0x153   : > { %v1143_v53 = vpop.f32.mrf.mxu1 }
 0x154   : > { %v788_v54 = vadd.f32 %v784_v49, %v704_v51  ;;  %v940_v55 = vpop.f32.mrf.mxu0 }
 0x155   : > { %v862_v56 = vpop.f32.mrf.mxu1 }
 0x156   : > { %v866_v57 = vadd.f32 %v862_v56, %v788_v54  ;;  %v1158_v58 = vpop.f32.mrf.mxu0 }
 0x157   : > { %v1153_v59 = vpop.f32.mrf.mxu1 }
 0x158   : > { %v944_v60 = vadd.f32 %v940_v55, %v866_v57 }
 0x15a   : > { %947 = vst.msk [vmem:[%s1332_s18 + $0x4] sm:$0xf] %vm945_vm7, %v944_v60  ;;  %v953_v62 = vsel %vm945_vm7, %v944_v60, 0.0  ;;  %v962_v63 = vmul.f32 %v944_v60, %v944_v60 }
 0x15b   : > { %954 = vadd.xlane.f32.xlu0 %v953_v62 }
 0x15c   : > { %v963_v0 = vsel %vm945_vm7, %v962_v63, 0.0 }
 0x15d   : > { %964 = vadd.xlane.f32.xlu1 %v963_v0 }
 0x15f   : > { %959 = vadd.xlane.f32.xlu0 %v958_v1 }
 0x1e4   : > { %v955_v3 = vpop.xlane.xlu0 %954 }
 0x1e5   : > { %956 = vst.msk [vmem:[%s181_s21 + $0x4] sm:$0xf] %vm951_vm8, %v955_v3 }
 0x1e6   : > { %v965_v4 = vpop.xlane.xlu1 %964 }
 0x1e7   : > { %966 = vst.msk [vmem:[%s181_s21 + $0xc] sm:$0xf] %vm951_vm8, %v965_v4 }
 0x1e8   : > { %v960_v5 = vpop.xlane.xlu0 %959 }
 0x1e9   : > { %961 = vst.msk [vmem:[%s181_s21 + $0x8] sm:$0xf] %vm951_vm8, %v960_v5 }
 0x1ea PF: > { %s14_s12 = sadd.s32 1, %s1178_s12  }
 0x1eb   : > { %p11_p4 = scmp.ge.s32.totalorder %s14_s12, 4  }
 0x1ed   :  { %13 = sbr.rel (!%p11_p4) target bundleno = 1 (0x1), region = 81 }

</bundles_post_ra>
